<compile_context>
chip_gen: v7x
topology: tpu7x:2x2x1
jax: 0.10.0
libtpu: 0.0.40
codegen_flags: <defaults>
</compile_context>

<pallas_src>
import math

import jax
import jax.numpy as jnp
from jax.experimental import pallas as pl
from jax.experimental.pallas import tpu as pltpu

_LANE = 128
_BF16_SUBLANE = 16  # a bf16 vreg packs [16, 128]


def _round_up(x, m):
    return ((x + m - 1) // m) * m


def _vmem_budget():
    """Generation-aware (budget, vmem_limit_bytes).

    v5e/v6e: 128 MiB physical VMEM -> ~64 MiB tile budget.
    v7x:      64 MiB physical VMEM -> ~38 MiB tile budget.
    """
    cap = 64 << 20  # conservative fallback = v7x per-TC physical VMEM
    try:
        info = pltpu.get_tpu_info()
        cap = int(getattr(info, "vmem_capacity_bytes", cap)) or cap
    except Exception:
        pass
    budget = min(64 << 20, int(cap * 0.6))
    limit = min(cap - (4 << 20), budget + (16 << 20))
    return budget, limit


def _pick_col_tile(op):
    """Lane-dense column tile (<=512); prefer >=2 column blocks so a 'parallel'
    grid axis exists even when the batch fits one block (keeps both v7x TCs busy)."""
    for tn in (512, 384, 256, 128):
        if tn <= op and op % tn == 0 and op // tn >= 2:
            return tn
    return op if op <= 512 else _LANE


def _pick_k_tile(tm, tn, dp, budget):
    """Largest K tile (divisor of dp) whose double-buffered tiles fit the budget."""

    def fits(tk):
        w_bytes = 2 * tk * tn * 2      # bf16 weight tile, double buffered
        x_bytes = 2 * tm * tk * 4      # f32 activation tile, double buffered
        b_bytes = 2 * tn * 4           # bias column block
        o_bytes = 2 * tm * tn * 4      # f32 output/accumulator block
        return w_bytes + x_bytes + b_bytes + o_bytes <= budget

    for tk in (dp, 32768, 16384, 8192, 4096, 2048, 1024, 512, 256, 128):
        if tk <= dp and dp % tk == 0 and fits(tk):
            return tk
    return _LANE


def _fc_relu_kernel(x_ref, w_ref, b_ref, o_ref):
    # x_ref: [TM, TK] f32    w_ref: [1, TK, TN] bf16    b_ref: [1, TN] f32
    # o_ref: [TM, TN] f32 — resident across the K axis (index_map ignores k);
    # doubles as the accumulator, so no extra VMEM scratch is needed.
    k = pl.program_id(2)

    @pl.when(k == 0)
    def _():
        o_ref[...] = jnp.broadcast_to(b_ref[...], o_ref.shape)

    o_ref[...] += jnp.dot(
        x_ref[...].astype(jnp.bfloat16), w_ref[0],
        preferred_element_type=jnp.float32,
    )

    @pl.when(k == pl.num_programs(2) - 1)
    def _():
        o_ref[...] = jnp.maximum(o_ref[...], 0.0)


def visual_fc_pallas(x_flat, w_blocked, b_padded, out_features):
    """relu(x @ W + b): f32 activations (cast to bf16 in-kernel), bf16 weights,
    f32 MXU accumulation directly into the resident output block."""
    B, D = x_flat.shape
    n_col, Dp, tn = w_blocked.shape
    Op = n_col * tn
    assert D <= Dp and b_padded.shape == (1, Op), (D, Dp, b_padded.shape, Op)

    budget, vmem_limit = _vmem_budget()

    tm = min(256, _round_up(max(B, 1), _BF16_SUBLANE))
    Bp = _round_up(B, tm)
    tk = _pick_k_tile(tm, tn, Dp, budget)

    pad_b, pad_d = Bp - B, Dp - D
    x_p = x_flat if (pad_b == 0 and pad_d == 0) else jnp.pad(
        x_flat, ((0, pad_b), (0, pad_d)))

    n_row, n_k = Bp // tm, Dp // tk

    cost = pl.CostEstimate(
        flops=2 * Bp * Dp * Op,
        transcendentals=0,
        bytes_accessed=Bp * Dp * 4 + Dp * Op * 2 + Op * 4 + Bp * Op * 4,
    )

    out = pl.pallas_call(
        _fc_relu_kernel,
        out_shape=jax.ShapeDtypeStruct((Bp, Op), jnp.float32),
        grid_spec=pltpu.PrefetchScalarGridSpec(
            num_scalar_prefetch=0,
            grid=(n_row, n_col, n_k),
            in_specs=[
                pl.BlockSpec((tm, tk), lambda i, j, k: (i, k)),        # activations
                pl.BlockSpec((1, tk, tn), lambda i, j, k: (j, k, 0)),  # contiguous W tile
                pl.BlockSpec((1, tn), lambda i, j, k: (0, j)),         # bias column block
            ],
            out_specs=pl.BlockSpec((tm, tn), lambda i, j, k: (i, j)),
        ),
        compiler_params=pltpu.CompilerParams(
            dimension_semantics=("parallel", "parallel", "arbitrary"),
            vmem_limit_bytes=vmem_limit,
        ),
        cost_estimate=cost,
    )(x_p, w_blocked, b_padded)
    return out[:B, :out_features]


class ResnetEncoderPallas:
    """JAX/Pallas port of ResnetEncoder.forward (spatial_output=False path)."""

    def __init__(self, visual_encoder_output_shape, output_size=256, key=None):
        # visual_encoder_output_shape: (C, H, W) of the backbone feature map.
        self.visual_encoder_output_shape = tuple(visual_encoder_output_shape)
        self.output_size = output_size
        fan_in = int(math.prod(self.visual_encoder_output_shape))
        self._fan_in = fan_in
        if key is None:
            key = jax.random.PRNGKey(0)
        kw, kb = jax.random.split(key)
        bound = 1.0 / math.sqrt(fan_in)
        # torch.nn.Linear stores weight as [out, in]; we keep the transpose [in, out].
        w = jax.random.uniform(kw, (fan_in, output_size), jnp.float32, -bound, bound)
        b = jax.random.uniform(kb, (output_size,), jnp.float32, -bound, bound)

        # Pad to lane-aligned (Dp, Op), pick the column tile, and store the
        # weight column-block-major [n_col, Dp, tn] so every (tk, tn) weight
        # tile is a single contiguous HBM DMA.  bf16 weights halve HBM traffic;
        # accumulation stays f32 inside the kernel.
        Dp = _round_up(fan_in, _LANE)
        Op = _round_up(output_size, _LANE)
        tn = _pick_col_tile(Op)
        n_col = Op // tn
        w_p = jnp.pad(w, ((0, Dp - fan_in), (0, Op - output_size)))
        self.fc_w = jnp.transpose(
            w_p.reshape(Dp, n_col, tn), (1, 0, 2)).astype(jnp.bfloat16)
        self.fc_b = jnp.pad(b, (0, Op - output_size)).reshape(1, Op).astype(jnp.float32)
        self.output_shape = (output_size,)

    def dense_weight(self):
        """Reconstruct the [fan_in, output_size] f32 weight (for reference checks)."""
        n_col, Dp, tn = self.fc_w.shape
        w = jnp.transpose(self.fc_w.astype(jnp.float32), (1, 0, 2)).reshape(Dp, n_col * tn)
        return w[: self._fan_in, : self.output_size]

    def __call__(self, observations):
        # Work on a shallow copy: never mutate the caller's dict.
        obs = dict(observations)
        obs_rgb = obs["rgb"]
        if obs_rgb.ndim == 5:
            obs["rgb"] = obs_rgb.reshape(-1, *obs_rgb.shape[2:])
            obs["depth"] = obs["depth"].reshape(-1, *obs["depth"].shape[2:])
            obs["semantic"] = obs["semantic"].reshape(-1, *obs["semantic"].shape[2:])

        if "rgb_features" in obs:
            x = obs["rgb_features"]                    # [B, C, H, W] (or [B, T, C, H, W])
            if x.ndim == 5:
                x = x.reshape(-1, *x.shape[2:])        # flatten B*T like the sensors
        else:
            # TODO(synk): habitat ResNetEncoder backbone not defined in the snippet.
            raise NotImplementedError("visual_encoder backbone not provided")

        # Flatten (row-major, same as torch Flatten on NCHW), then FC+ReLU kernel.
        x_flat = x.reshape(x.shape[0], -1)
        return visual_fc_pallas(x_flat, self.fc_w, self.fc_b, self.output_size)


if __name__ == "__main__":
    key = jax.random.PRNGKey(0)
    k_feat, k_rgb, k_depth, k_sem, k_param = jax.random.split(key, 5)

    B = 2
    C, H, W = 32, 4, 4          # small synthetic backbone output shape
    OUTPUT_SIZE = 256

    observations = {
        # raw sensors (pass-through glue in this code path)
        "rgb": jax.random.uniform(k_rgb, (B, 16, 16, 3), jnp.float32),
        "depth": jax.random.uniform(k_depth, (B, 16, 16, 1), jnp.float32),
        "semantic": jax.random.uniform(k_sem, (B, 16, 16, 1), jnp.float32),
        # precomputed backbone features — the module's documented fast path
        "rgb_features": jax.random.normal(k_feat, (B, C, H, W), jnp.float32),
    }

    enc = ResnetEncoderPallas((C, H, W), output_size=OUTPUT_SIZE, key=k_param)

    out = enc(observations)
    out = jax.block_until_ready(out)
    assert out.shape == (B, OUTPUT_SIZE), out.shape

    x_flat = observations["rgb_features"].reshape(B, -1)
    w_f32 = enc.dense_weight()
    b_f32 = enc.fc_b[0, :OUTPUT_SIZE]

    # Reference 1: same bf16-input / f32-accumulate math in plain JAX (tight tol).
    ref_bf16 = jnp.maximum(
        jnp.dot(x_flat.astype(jnp.bfloat16), w_f32.astype(jnp.bfloat16),
                preferred_element_type=jnp.float32) + b_f32, 0.0)
    assert jnp.allclose(out, ref_bf16, atol=2e-3, rtol=2e-3), "mismatch vs bf16 ref"

    # Reference 2: full-f32 PyTorch-style reference (loose tol: bf16 rounding drift).
    ref_f32 = jnp.maximum(x_flat @ w_f32 + b_f32, 0.0)
    assert jnp.allclose(out, ref_f32, atol=5e-2, rtol=5e-2), "drift vs f32 ref too big"

    print("KERNEL_OK")
</pallas_src>

<mosaic_0001>
module attributes {stable_mosaic.version = 11 : i64} {
  func.func @_fc_relu_kernel(%arg0: i32, %arg1: i32, %arg2: i32, %arg3: memref<16x512xf32, #tpu.memory_space<vmem>>, %arg4: memref<1x512x128xbf16, #tpu.memory_space<vmem>>, %arg5: memref<1x128xf32, #tpu.memory_space<vmem>>, %arg6: memref<16x128xf32, #tpu.memory_space<vmem>>) attributes {dimension_semantics = [#tpu.dimension_semantics<parallel>, #tpu.dimension_semantics<parallel>, #tpu.dimension_semantics<arbitrary>], iteration_bounds = array<i64: 1, 2, 1>, scalar_prefetch = 0 : i64, scratch_operands = 0 : i64, tpu.core_type = #tpu.core_type<tc>, window_params = [{transform_indices = @transform_0, window_bounds = array<i64: 16, 512>}, {transform_indices = @transform_1, window_bounds = array<i64: 1, 512, 128>}, {transform_indices = @transform_2, window_bounds = array<i64: 1, 128>}, {transform_indices = @transform_3, window_bounds = array<i64: 16, 128>}]} {
    %c0_i32 = arith.constant 0 : i32
    %0 = arith.cmpi eq, %arg2, %c0_i32 : i32
    %1 = arith.extui %0 : i1 to i32
    %c0_i32_0 = arith.constant 0 : i32
    %2 = arith.cmpi ne, %1, %c0_i32_0 : i32
    scf.if %2 {
      %c0_11 = arith.constant 0 : index
      %c0_12 = arith.constant 0 : index
      %14 = vector.load %arg5[%c0_11, %c0_12] : memref<1x128xf32, #tpu.memory_space<vmem>>, vector<1x128xf32>
      %15 = vector.shape_cast %14 : vector<1x128xf32> to vector<1x128xf32>
      %16 = vector.broadcast %15 : vector<1x128xf32> to vector<16x128xf32>
      %c0_13 = arith.constant 0 : index
      %c0_14 = arith.constant 0 : index
      %17 = vector.load %arg6[%c0_13, %c0_14] : memref<16x128xf32, #tpu.memory_space<vmem>>, vector<16x128xf32>
      tpu.vector_store %arg6[%c0_13, %c0_14], %16 {strides = array<i32>} : memref<16x128xf32, #tpu.memory_space<vmem>>, vector<16x128xf32>,
    } else {
    }
    %c0 = arith.constant 0 : index
    %c0_1 = arith.constant 0 : index
    %3 = vector.load %arg6[%c0, %c0_1] : memref<16x128xf32, #tpu.memory_space<vmem>>, vector<16x128xf32>
    %c0_2 = arith.constant 0 : index
    %c0_3 = arith.constant 0 : index
    %4 = vector.load %arg3[%c0_2, %c0_3] : memref<16x512xf32, #tpu.memory_space<vmem>>, vector<16x512xf32>
    %5 = arith.truncf %4 : vector<16x512xf32> to vector<16x512xbf16>
    %c0_4 = arith.constant 0 : index
    %c0_5 = arith.constant 0 : index
    %c0_6 = arith.constant 0 : index
    %6 = vector.load %arg4[%c0_4, %c0_5, %c0_6] : memref<1x512x128xbf16, #tpu.memory_space<vmem>>, vector<1x512x128xbf16>
    %7 = vector.shape_cast %6 : vector<1x512x128xbf16> to vector<512x128xbf16>
    %cst = arith.constant dense<0.000000e+00> : vector<16x128xf32>
    %8 = tpu.matmul %5, %7, %cst {dimension_numbers = #tpu.dot_dimension_numbers<[1], [0], [0], [1], [0, 0, 1, 1], [], []>} : vector<16x512xbf16>, vector<512x128xbf16>, vector<16x128xf32> -> vector<16x128xf32>
    %9 = arith.addf %3, %8 : vector<16x128xf32>
    %c0_7 = arith.constant 0 : index
    %c0_8 = arith.constant 0 : index
    %10 = vector.load %arg6[%c0_7, %c0_8] : memref<16x128xf32, #tpu.memory_space<vmem>>, vector<16x128xf32>
    tpu.vector_store %arg6[%c0_7, %c0_8], %9 {strides = array<i32>} : memref<16x128xf32, #tpu.memory_space<vmem>>, vector<16x128xf32>,
    %c0_i32_9 = arith.constant 0 : i32
    %11 = arith.cmpi eq, %arg2, %c0_i32_9 : i32
    %12 = arith.extui %11 : i1 to i32
    %c0_i32_10 = arith.constant 0 : i32
    %13 = arith.cmpi ne, %12, %c0_i32_10 : i32
    scf.if %13 {
      %c0_11 = arith.constant 0 : index
      %c0_12 = arith.constant 0 : index
      %14 = vector.load %arg6[%c0_11, %c0_12] : memref<16x128xf32, #tpu.memory_space<vmem>>, vector<16x128xf32>
      %cst_13 = arith.constant 0.000000e+00 : f32
      %15 = vector.broadcast %cst_13 : f32 to vector<16x128xf32>
      %16 = arith.maximumf %14, %15 : vector<16x128xf32>
      %c0_14 = arith.constant 0 : index
      %c0_15 = arith.constant 0 : index
      %17 = vector.load %arg6[%c0_14, %c0_15] : memref<16x128xf32, #tpu.memory_space<vmem>>, vector<16x128xf32>
      tpu.vector_store %arg6[%c0_14, %c0_15], %16 {strides = array<i32>} : memref<16x128xf32, #tpu.memory_space<vmem>>, vector<16x128xf32>,
    } else {
    }
    return
  }
  func.func @transform_0(%arg0: i32, %arg1: i32, %arg2: i32) -> (i32, i32) {
    %c0_i32 = arith.constant 0 : i32
    return %arg0, %arg2 : i32, i32
  }
  func.func @transform_1(%arg0: i32, %arg1: i32, %arg2: i32) -> (i32, i32, i32) {
    %c0_i32 = arith.constant 0 : i32
    %c0_i32_0 = arith.constant 0 : i32
    return %arg1, %arg2, %c0_i32 : i32, i32, i32
  }
  func.func @transform_2(%arg0: i32, %arg1: i32, %arg2: i32) -> (i32, i32) {
    %c0_i32 = arith.constant 0 : i32
    %c0_i32_0 = arith.constant 0 : i32
    return %c0_i32, %arg1 : i32, i32
  }
  func.func @transform_3(%arg0: i32, %arg1: i32, %arg2: i32) -> (i32, i32) {
    %c0_i32 = arith.constant 0 : i32
    return %arg0, %arg1 : i32, i32
  }
}

</mosaic_0001>

<bundles_post_ra>
// kernel: tpu_custom_call.1
= control target key start
LH: loop header
LB: loop body
LE: loop exit
PB: predicated region body
PF: predicated region fallthrough
CT: control target
= control target key end

     0   :  { %8 = vsyncpa [#allocation3], 0  ;;  %s1411_s0 = inlined_call_operand.hbm [shape: f32[16,512], index: 0, kind: input, shape index: {}]   ;;  %s1412_s1 = inlined_call_operand.hbm [shape: bf16[2,512,128], index: 1, kind: input, shape index: {}]   ;;  %s1413_s2 = inlined_call_operand.vmem [shape: f32[1,256], index: 2, kind: input, shape index: {}]   ;;  %s1414_s3 = inlined_call_operand.hbm [shape: f32[16,256], index: 3, kind: output, shape index: {}]  }
   0x1   :  { %9 = vsyncpa [#allocation6], 0 }
   0x2   :  { %11 = vsyncpa [#allocation6 + $0x1], 0 }
   0x3   :  { %12 = vsyncpa [#allocation4], 0 }
   0x4   :  { %14 = vsyncpa [#allocation4 + $0x1], 0  ;;  %s1152_s12 = smov 0   ;;  %s1154_s13 = smov 0  }
   0x5   :  { %s1156_s14 = smov 0   ;;  %s1158_s15 = smov 0  }
   0x6   :  { %s1160_s16 = smov 0   ;;  %s1162_s17 = smov 0  }
   0x7 LB: > { %s770_s18 = sadd.s32 4294967295, %s1120_s17   ;;  %s771_s19 = sadd.s32 4294967294, %s1120_s17   ;;  %s1120_s17 = sphi %s1162_s17, %s20_s17   ;;  %s1116_s16 = sphi %s1160_s16, %s1438_s16   ;;  %s1112_s15 = sphi %s1158_s15, %s1437_s15   ;;  %s1108_s14 = sphi %s1156_s14, %s1436_s14   ;;  %s1104_s13 = sphi %s1154_s13, %s1435_s13   ;;  %s1100_s12 = sphi %s1152_s12, %s1434_s12  }
   0x8   : > { %p89_p0 = scmp.ne.s32.totalorder %s1104_s13, %s1100_s12  ;;  %p1186_p1 = scmp.eq.s32.totalorder %s770_s18, 0 }
   0x9   : > { %p1190_p2 = scmp.eq.s32.totalorder %s770_s18, 1  ;;  %p147_p3 = scmp.eq.s32.totalorder %s771_s19, 1 }
   0xa   : > { %s1419_s20 = scalar_select %p1186_p1, 1, 0 }
   0xb   : > { %s1420_s21 = scalar_select %p1190_p2, 1, 0 }
   0xc   : > { %p1196_p4 = por %p1186_p1, %p89_p0  ;;  %p772_p5 = scmp.ge.s32.totalorder %s1120_s17, 1 }
   0xd   : > { %p1201_p6 = por %p147_p3, %p89_p0  ;;  %p154_p7 = scmp.lt.s32.totalorder %s1120_s17, 3 }
   0xe   : > { %s1421_s22 = scalar_select %p1196_p4, 1, 0 }
   0xf   : > { %s1422_s23 = scalar_select %p1201_p6, 1, 0 }
  0x10   : > { %p1206_p8 = pnand %p772_p5, %p154_p7  ;;  %s1122_s25 = smov [#allocation2]  }
  0x11   : > { %s172_s26 = sshll.u32 %s1122_s25, 4  ;;  %s35_s28 = sadd.s32 1, %s1116_s16  ;;  %s173_s26 = int_to_ptr.vmem [resolvable:$true] %s172_s26 }
  0x12   : > { %s1423_s24 = scalar_select %p1206_p8, 1, 0 }
  0x13   : > { %p872_p9 = pneg %p1206_p8  ;;  %s976_s4 = scalar_lea.hbm %s1411_s0, 1024 }
  0x14   : > { %p977_p12 = scmp.ne.s32.totalorder %s1411_s0, %s976_s4  ;;  %p983_p5 = scmp.lt.u32.totalorder %s976_s4, %s1411_s0 }
  0x15   : > { %p1215_p11 = pnand %p872_p9, %p1186_p1 }
  0x17   : > { %p978_p13 = pneg %p1215_p11 }
  0x19   : > { %p979_p0 = pnand %p978_p13, %p977_p12 }
  0x1b   : > { %p980_p3 = pneg %p979_p0 }
  0x1d   : > { %p985_p7 = pnand %p983_p5, %p980_p3 }
  0x1f   : > { %988 = shalt.err (!%p985_p7)
}
  0x20   : > { %s989_s9 = scalar_lea.vmem %s173_s26, 1024  ;;  %p997_p4 = scmp.lt.s32.totalorder %s173_s26, %s173_s26 }
  0x21   : > { %p990_p9 = scmp.ne.s32.totalorder %s173_s26, %s989_s9  ;;  %p998_p1 = scmp.lt.s32.totalorder %s989_s9, %s989_s9 }
  0x23   : > { %p992_p10 = pnand %p990_p9, %p978_p13  ;;  %p999_p8 = por %p998_p1, %p997_p4 }
  0x25   : > { %p993_p6 = pneg %p992_p10 }
  0x27   : > { %p1000_p2 = pnand %p999_p8, %p993_p6 }
  0x29   : > { %1003 = shalt.err (!%p1000_p2)
}
  0x2a   : > { %s1123_s10 = smov 512   ;;  %s1124_s11 = smov 32  }
  0x2b   : > { %875 = dma.hbm_to_vmem [thread:$0]  (!%p1215_p11), %s1411_s0, 1024, %s173_s26, [#allocation3], %s1123_s10, %s1123_s10, %s1124_s11  }
  0x2c   : > { %p37_p1 = scmp.ge.s32.totalorder %s35_s28, 2  ;;  %s76_s25 = sadd.s32 1, %s1108_s14 }
  0x2d   : > { %p83_p2 = scmp.ne.s32.totalorder %s1108_s14, %s1104_s13  ;;  %p84_p4 = scmp.eq.s32.totalorder %s1120_s17, 0 }
  0x2e   : > { %s1440_s28 = smov (%p37_p1, %s35_s28), 0  ;;  %p1426_p8 = scmp.ne.s32.totalorder %s1420_s21, 0 }
  0x2f   : > { %p1242_p6 = por %p84_p4, %p83_p2  ;;  %s71_s27 = ssub.s32 %s1116_s16, %s1440_s28 }
  0x30   : > { %p1248_p10 = por %p1426_p8, %p83_p2  ;;  %p885_p12 = scmp.lt.s32.totalorder %s1120_s17, 2 }
  0x31   : > { %p74_p11 = scmp.eq.s32.totalorder %s71_s27, 0  ;;  %s186_s26 = sand.u32 1, %s1108_s14  }
  0x32   : > { %s775_s4 = sshll.u32 %s186_s26, 8  ;;  %s819_s6 = sshll.u32 %s1116_s16, 12 }
  0x33   : > { %s1257_s5 = scalar_select %p74_p11, %s1108_s14, %s76_s25  }
  0x34   : > { %s1263_s9 = scalar_lea.hbm %s1412_s1, %s819_s6  ;;  %s190_s21 = scalar_lea.vmem [#allocation5], %s775_s4 }
  0x35   : > { %s199_s10 = sshll.u32 %s190_s21, 4  ;;  %p1269_p13 = pnand %p885_p12, %p1242_p6  ;;  %s1265_s10 = int_to_ptr.vmem [resolvable:$true] %s199_s10 }
  0x36   : > { %s1273_s18 = scalar_lea.sflag [#allocation6], %s186_s26  ;;  %s1004_s19 = scalar_lea.hbm %s1263_s9, 4096 }
  0x37   : > { %p1005_p0 = scmp.ne.s32.totalorder %s1263_s9, %s1004_s19  ;;  %p1006_p3 = pneg %p1269_p13 }
  0x38   : > { %s1009_s29 = scalar_lea.hbm %s1412_s1, 8192  ;;  %p1010_p9 = scmp.lt.u32.totalorder %s1263_s9, %s1412_s1 }
  0x39   : > { %p1007_p5 = pnand %p1006_p3, %p1005_p0  ;;  %p1011_p1 = scmp.lt.u32.totalorder %s1009_s29, %s1004_s19 }
  0x3a   : > { %p1013_p4 = scmp.lt.u32.totalorder %s1004_s19, %s1263_s9 }
  0x3b   : > { %p1008_p7 = pneg %p1007_p5  ;;  %p1012_p2 = por %p1011_p1, %p1010_p9 }
  0x3d   : > { %p1014_p6 = por %p1013_p4, %p1012_p2 }
  0x3f   : > { %p1015_p8 = pnand %p1014_p6, %p1008_p7 }
  0x41   : > { %1018 = shalt.err (!%p1015_p8)
}
  0x42   : > { %s1019_s26 = scalar_lea.vmem %s1265_s10, 4096  ;;  %s1125_s7 = smov [#allocation5]  }
  0x43   : > { %p1020_p12 = scmp.ne.s32.totalorder %s1265_s10, %s1019_s26  ;;  %s1024_s8 = sshll.u32 %s1125_s7, 4  ;;  %s1025_s8 = int_to_ptr.vmem [resolvable:$false] %s1024_s8 }
  0x44   : > { %s1026_s21 = scalar_lea.vmem %s1025_s8, 8192  ;;  %p1027_p5 = scmp.lt.s32.totalorder %s1265_s10, %s1025_s8 }
  0x45   : > { %p1022_p11 = pnand %p1020_p12, %p1006_p3  ;;  %p1028_p9 = scmp.lt.s32.totalorder %s1026_s21, %s1019_s26 }
  0x47   : > { %p1023_p0 = pneg %p1022_p11  ;;  %p1029_p1 = por %p1028_p9, %p1027_p5 }
  0x49   : > { %p1030_p2 = pnand %p1029_p1, %p1023_p0 }
  0x4b   : > { %1033 = shalt.err (!%p1030_p2)
}
  0x4c   : > { %s1126_s19 = smov 64   ;;  %s1127_s25 = smov 4  }
  0x4d   : > { %879 = dma.hbm_to_vmem [thread:$0]  (!%p1269_p13), %s1263_s9, 4096, %s1265_s10, %s1273_s18, %s1126_s19, %s1126_s19, %s1127_s25  }
  0x4e   : > { %p1429_p3 = scmp.ne.s32.totalorder %s1423_s24, 0 }
  0x4f   : > { %p1430_p7 = scmp.ne.s32.totalorder (!%p1429_p3), %s1419_s20, 0 }
  0x50   : > { %217 = sbr.rel (%p1429_p3) target bundleno = 366 (0x16e), region = 32 }
  0x57   : > { %1087 = dma.done.wait (%p1430_p7), [#allocation3], 1024  }
  0x58   : > { %1089 = vsyncadd (%p1430_p7), [#allocation3], 4294966272  ;;  %s1308_s27 = sand.u32 1, %s1104_s13   ;;  %p1431_p13 = scmp.ne.s32.totalorder %s1421_s22, 0 }
  0x59   : > { %s780_s29 = sshll.u32 %s1308_s27, 8  ;;  %s224_s4 = scalar_lea.sflag [#allocation6], %s1308_s27 }
  0x5a   : > { %s1312_s6 = scalar_lea.vmem [#allocation5], %s780_s29 }
  0x5b   : > { %1091 = dma.done.wait (%p1431_p13), %s224_s4, 4096  }
  0x5c   : > { %1093 = vsyncadd (%p1431_p13), %s224_s4, 4294963200  ;;  %v944_v0 = vld [vmem:[%s1312_s6 + $0x40] sm:$0xff]   ;;  %v948_v4 = vld [vmem:[%s1312_s6 + $0x48] sm:$0xff]   ;;  %p256_p4 = scmp.lt.s32.totalorder %s1112_s15, 1  ;;  %s781_s22 = sshll.u32 %s1308_s27, 4 }
  0x5d   : > { %v945_v1 = vld [vmem:[%s1312_s6 + $0xc0] sm:$0xff]   ;;  %820 = vmatprep.subr.bf16.mxu0 %v944_v0  ;;  %v949_v5 = vld [vmem:[%s1312_s6 + $0xc8] sm:$0xff]   ;;  %v952_v8 = vld [vmem:[%s1312_s6 + $0x50] sm:$0xff]   ;;  %s816_s11 = sshll.u32 %s1112_s15, 7  ;;  %s252_s18 = scalar_lea.vmem [#allocation7], %s781_s22 }
  0x5e   : > { %v946_v2 = vld [vmem:[%s1312_s6] sm:$0xff]   ;;  %842 = vmatprep.subr.bf16.mxu1 %v945_v1  ;;  %v950_v6 = vld [vmem:[%s1312_s6 + $0x8] sm:$0xff]   ;;  %v953_v9 = vld [vmem:[%s1312_s6 + $0xd0] sm:$0xff]   ;;  %s257_s20 = scalar_select %p256_p4, %s1112_s15, 1 }
  0x5f   : > { %v947_v3 = vld [vmem:[%s1312_s6 + $0x80] sm:$0xff]   ;;  %821 = vmatpush3.bf16.msra.mxu0 %v946_v2  ;;  %v951_v7 = vld [vmem:[%s1312_s6 + $0x88] sm:$0xff]   ;;  %v954_v10 = vld [vmem:[%s1312_s6 + $0x10] sm:$0xff]   ;;  %s655_s26 = sshll.u32 %s252_s18, 4  ;;  %s1360_s21 = scalar_lea.hbm %s1414_s3, %s816_s11  ;;  %s1362_s26 = int_to_ptr.vmem [resolvable:$true] %s655_s26 }
  0x60   : > { %843 = vmatpush3.bf16.msra.mxu1 %v947_v3  ;;  %822 = vmatprep.subr.bf16.mxu0 %v948_v4  ;;  %v955_v11 = vld [vmem:[%s1312_s6 + $0x90] sm:$0xff]   ;;  %v956_v12 = vld [vmem:[%s1312_s6 + $0x58] sm:$0xff]   ;;  %v960_v16 = vld [vmem:[%s1312_s6 + $0x60] sm:$0xff]   ;;  %s258_s10 = scalar_lea.vmem %s1413_s2, %s257_s20  ;;  %s640_s15 = scalar_lea.sflag [#allocation4], %s1308_s27 }
  0x61   : > { %844 = vmatprep.subr.bf16.mxu1 %v949_v5  ;;  %v957_v13 = vld [vmem:[%s1312_s6 + $0xd8] sm:$0xff]   ;;  %v961_v17 = vld [vmem:[%s1312_s6 + $0xe0] sm:$0xff]   ;;  %v964_v20 = vld [vmem:[%s1312_s6 + $0x68] sm:$0xff]   ;;  %s1034_s19 = scalar_lea.vmem %s1362_s26, 256  ;;  %s1128_s25 = smov [#allocation7]  }
  0x62   : > { %v958_v14 = vld [vmem:[%s1312_s6 + $0x18] sm:$0xff]   ;;  %v962_v18 = vld [vmem:[%s1312_s6 + $0x20] sm:$0xff]   ;;  %v965_v21 = vld [vmem:[%s1312_s6 + $0xe8] sm:$0xff]   ;;  %p1035_p6 = scmp.ne.s32.totalorder %s1362_s26, %s1034_s19  ;;  %s1038_s29 = sshll.u32 %s1128_s25, 4  ;;  %s1039_s29 = int_to_ptr.vmem [resolvable:$false] %s1038_s29 }
  0x63   : > { %823 = vmatpush3.bf16.msra.mxu0 %v950_v6  ;;  %v959_v15 = vld [vmem:[%s1312_s6 + $0x98] sm:$0xff]   ;;  %v963_v19 = vld [vmem:[%s1312_s6 + $0xa0] sm:$0xff]   ;;  %v966_v22 = vld [vmem:[%s1312_s6 + $0x28] sm:$0xff]   ;;  %s1040_s4 = scalar_lea.vmem %s1039_s29, 512  ;;  %p1041_p11 = scmp.lt.s32.totalorder %s1362_s26, %s1039_s29 }
  0x64   : > { %845 = vmatpush3.bf16.msra.mxu1 %v951_v7  ;;  %824 = vmatprep.subr.bf16.mxu0 %v952_v8  ;;  %v967_v23 = vld [vmem:[%s1312_s6 + $0xa8] sm:$0xff]   ;;  %v968_v24 = vld [vmem:[%s1312_s6 + $0x70] sm:$0xff]   ;;  %v972_v28 = vld [vmem:[%s1312_s6 + $0x78] sm:$0xff]   ;;  %p1036_p8 = pnand %p1035_p6, %p1248_p10  ;;  %p1042_p0 = scmp.lt.s32.totalorder %s1040_s4, %s1034_s19 }
  0x65   : > { %846 = vmatprep.subr.bf16.mxu1 %v953_v9  ;;  %v969_v25 = vld [vmem:[%s1312_s6 + $0xf0] sm:$0xff]   ;;  %v973_v29 = vld [vmem:[%s1312_s6 + $0xf8] sm:$0xff]   ;;  %v277_v32 = vld [vmem:[#allocation2 + $0x8] sm:$0xff] }
  0x66   : > { %v970_v26 = vld [vmem:[%s1312_s6 + $0x30] sm:$0xff]   ;;  %v974_v30 = vld [vmem:[%s1312_s6 + $0x38] sm:$0xff]   ;;  %v281_v33 = vld [vmem:[#allocation2 + $0x28] sm:$0xff]  ;;  %p1037_p12 = pneg %p1036_p8  ;;  %p1043_p5 = por %p1042_p0, %p1041_p11 }
  0x67   : > { %825 = vmatpush3.bf16.msra.mxu0 %v954_v10  ;;  %v971_v27 = vld [vmem:[%s1312_s6 + $0xb0] sm:$0xff]   ;;  %v975_v31 = vld [vmem:[%s1312_s6 + $0xb8] sm:$0xff]   ;;  %v285_v35 = vpack.c.bf16 %v281_v33, %v277_v32  ;;  %v276_v37 = vld [vmem:[#allocation2] sm:$0xff] }
  0x68   : > { %847 = vmatpush3.bf16.msra.mxu1 %v955_v11  ;;  %826 = vmatprep.subr.bf16.mxu0 %v956_v12  ;;  %v279_v34 = vld [vmem:[#allocation2 + $0x18] sm:$0xff]  ;;  %v280_v38 = vld [vmem:[#allocation2 + $0x20] sm:$0xff]  ;;  %v278_v41 = vld [vmem:[#allocation2 + $0x10] sm:$0xff]  ;;  %p1044_p9 = pnand %p1043_p5, %p1037_p12 }
  0x69   : > { %848 = vmatprep.subr.bf16.mxu1 %v957_v13  ;;  %v283_v36 = vld [vmem:[#allocation2 + $0x38] sm:$0xff]  ;;  %v284_v40 = vpack.c.bf16 %v280_v38, %v276_v37  ;;  %v282_v42 = vld [vmem:[#allocation2 + $0x30] sm:$0xff]  ;;  %576 = vmatprep.mubr.bf16.mxu0 %v285_v35  ;;  %v782_v53 = vld [vmem:[%s258_s10] ss:$0 sm:$0xff] }
  0x6a   : > { %v287_v39 = vpack.c.bf16 %v283_v36, %v279_v34  ;;  %v286_v43 = vpack.c.bf16 %v282_v42, %v278_v41 }
  0x6b   : > { %827 = vmatpush3.bf16.msra.mxu0 %v958_v14 }
  0x6c   : > { %849 = vmatpush3.bf16.msra.mxu1 %v959_v15  ;;  %828 = vmatprep.subr.bf16.mxu0 %v960_v16 }
  0x6d   : > { %850 = vmatprep.subr.bf16.mxu1 %v961_v17  ;;  %617 = vmatprep.mubr.bf16.mxu1 %v287_v39 }
  0x6f   : > { %829 = vmatpush3.bf16.msra.mxu0 %v962_v18 }
  0x70   : > { %851 = vmatpush3.bf16.msra.mxu1 %v963_v19  ;;  %830 = vmatprep.subr.bf16.mxu0 %v964_v20 }
  0x71   : > { %852 = vmatprep.subr.bf16.mxu1 %v965_v21 }
  0x73   : > { %831 = vmatpush3.bf16.msra.mxu0 %v966_v22 }
  0x74   : > { %853 = vmatpush3.bf16.msra.mxu1 %v967_v23  ;;  %832 = vmatprep.subr.bf16.mxu0 %v968_v24 }
  0x75   : > { %854 = vmatprep.subr.bf16.mxu1 %v969_v25 }
  0x77   : > { %833 = vmatpush3.bf16.msra.mxu0 %v970_v26 }
  0x78   : > { %855 = vmatpush3.bf16.msra.mxu1 %v971_v27  ;;  %834 = vmatprep.subr.bf16.mxu0 %v972_v28 }
  0x79   : > { %856 = vmatprep.subr.bf16.mxu1 %v973_v29 }
  0x7b   : > { %835 = vmatpush3.bf16.msra.mxu0 %v974_v30 }
  0x7c   : > { %857 = vmatpush3.bf16.msra.mxu1 %v975_v31 }
  0x7e   : > { %577 = vmatmul.mubr.bf16.vlgmr.msra.gmra.mrb[0].mxu0 %v284_v40 }
  0x7f   : > { %618 = vmatmul.mubr.bf16.vlgmr.msra.gmra.mrb[0].mxu1 %v286_v43 }
 0x151   : > { %v836_v44 = vpop.f32.mrb[0].mxu0 }
 0x152   : > { %v858_v45 = vpop.f32.mrb[0].mxu1  ;;  %v837_v46 = vpop.f32.mrb[1].mxu0 }
 0x153   : > { %v838_v47 = vadd.f32 %v837_v46, %v836_v44  ;;  %v859_v48 = vpop.f32.mrb[1].mxu1  ;;  %v839_v49 = vpop.f32.mrb[2].mxu0 }
 0x154   : > { %v860_v50 = vadd.f32 %v859_v48, %v858_v45  ;;  %v861_v51 = vpop.f32.mrb[2].mxu1  ;;  %v840_v52 = vpop.f32.mrb[3].mxu0 }
 0x155   : > { %v841_v54 = vadd.f32 %v840_v52, %v839_v49  ;;  %v862_v55 = vpop.f32.mrb[3].mxu1 }
 0x156   : > { %v620_v56 = vadd.f32 %v860_v50, %v838_v47  ;;  %v863_v57 = vadd.f32 %v862_v55, %v861_v51 }
 0x158   : > { %v626_v58 = vadd.f32 %v782_v53, %v620_v56  ;;  %v623_v59 = vadd.f32 %v863_v57, %v841_v54 }
 0x15a   : > { %v635_v60 = vmax.f32 %v626_v58, 0.0  ;;  %v627_v61 = vadd.f32 %v782_v53, %v623_v59 }
 0x15c   : > { %637 = vst [vmem:[%s252_s18] sm:$0xff] %v635_v60  ;;  %v636_v62 = vmax.f32 %v627_v61, 0.0 }
 0x15e   : > { %638 = vst [vmem:[%s252_s18 + $0x8] sm:$0xff] %v636_v62 }
 0x15f   : > { %1047 = shalt.err (!%p1044_p9)
}
 0x160   : > { %s1048_s6 = scalar_lea.hbm %s1360_s21, 256  ;;  %s1052_s24 = scalar_lea.hbm %s1414_s3, 512 }
 0x161   : > { %p1049_p1 = scmp.ne.s32.totalorder %s1360_s21, %s1048_s6  ;;  %p1053_p7 = scmp.lt.u32.totalorder %s1360_s21, %s1414_s3 }
 0x162   : > { %p1054_p13 = scmp.lt.u32.totalorder %s1052_s24, %s1048_s6  ;;  %p1056_p6 = scmp.lt.u32.totalorder %s1048_s6, %s1360_s21 }
 0x163   : > { %p1050_p2 = pnand %p1049_p1, %p1248_p10 }
 0x164   : > { %p1055_p4 = por %p1054_p13, %p1053_p7 }
 0x165   : > { %p1051_p3 = pneg %p1050_p2 }
 0x166   : > { %p1057_p8 = por %p1056_p6, %p1055_p4 }
 0x168   : > { %p1058_p12 = pnand %p1057_p8, %p1051_p3 }
 0x16a   : > { %1061 = shalt.err (!%p1058_p12)
}
 0x16b   : > { %s1129_s11 = smov 128   ;;  %s1130_s18 = smov 256  }
 0x16c   : > { %s1131_s7 = smov 8  }
 0x16d   : > { %870 = dma.vmem_to_hbm [thread:$0]  (%p1248_p10), %s1362_s26, 256, %s1360_s21, %s640_s15, %s1129_s11, %s1130_s18, %s1131_s7  }
 0x16e PF: > { %s670_s8 = sand.u32 1, %s1100_s12   ;;  %p1432_p11 = scmp.ne.s32.totalorder %s1422_s23, 0 }
 0x16f   : > { %p1433_p0 = scmp.ge.s32.totalorder %s1120_s17, 2  ;;  %s671_s19 = scalar_lea.sflag [#allocation4], %s670_s8 }
 0x171   : > { %p881_p5 = pnand %p1433_p0, %p1432_p11 }
 0x173   : > { %1095 = dma.done.wait (!%p881_p5), %s671_s19, 256  }
 0x174   : > { %1097 = vsyncadd (!%p881_p5), %s671_s19, 4294967040  ;;  %s20_s17 = sadd.s32 1, %s1120_s17   ;;  %s1434_s12 = smov %s1104_s13 }
 0x175   : > { %p17_p9 = scmp.ge.s32.totalorder %s20_s17, 4   ;;  %s1435_s13 = smov %s1108_s14 }
 0x176   : > { %s1436_s14 = smov %s1257_s5  ;;  %s1437_s15 = smov %s1116_s16 }
 0x177   : > { %s1438_s16 = smov %s1440_s28  ;;  %19 = sbr.rel (!%p17_p9) target bundleno = 7 (0x7), region = 94 }
 0x17e   :  { %676 = vsyncpa [#allocation3], 1 }
 0x17f   :  { %678 = vsyncpa [#allocation3 + $0x1], 1 }
 0x180   :  { %679 = vsyncpa [#allocation6], 1 }
 0x181   :  { %681 = vsyncpa [#allocation6 + $0x1], 1 }
 0x182   :  { %682 = vsyncpa [#allocation4], 1 }
 0x183   :  { %684 = vsyncpa [#allocation4 + $0x1], 1 }

</bundles_post_ra>
